<compile_context>
chip_gen: v7x
topology: tpu7x:2x2x1
jax: 0.10.0
libtpu: 0.0.40
codegen_flags: <defaults>
</compile_context>

<pallas_src>
import functools

import jax
import jax.numpy as jnp
from jax import lax
from jax.experimental import pallas as pl
from jax.experimental.pallas import tpu as pltpu

LN_EPS = 1e-5  # PyTorch nn.LayerNorm default


def _round_up(x, m):
    return ((x + m - 1) // m) * m


def _cdiv(a, b):
    return (a + b - 1) // b


def _vmem_limit_bytes():
    """Generation-aware scoped VMEM limit (leave headroom below physical)."""
    try:
        cap = int(pltpu.get_tpu_info().vmem_capacity_bytes)
    except Exception:
        cap = 64 * 1024 * 1024
    return int(max(32 * 1024 * 1024,
                   min(cap - 16 * 1024 * 1024, 96 * 1024 * 1024)))


# ---------------------------------------------------------------------------
# Probe: is pipeline_mode=pl.Buffered(1) (single-buffered constant inputs)
# supported by the installed Pallas?  Cached; falls back to default buffering.
# ---------------------------------------------------------------------------
_SINGLE_BUFFER_OK = None


def _single_buffer_supported():
    global _SINGLE_BUFFER_OK
    if _SINGLE_BUFFER_OK is not None:
        return _SINGLE_BUFFER_OK
    if not hasattr(pl, "Buffered"):
        _SINGLE_BUFFER_OK = False
        return False
    try:
        def _probe_kernel(x_ref, o_ref):
            o_ref[...] = x_ref[...] + 1.0

        out = pl.pallas_call(
            _probe_kernel,
            out_shape=jax.ShapeDtypeStruct((8, 128), jnp.float32),
            grid=(2,),
            in_specs=[pl.BlockSpec((8, 128), lambda i: (0, 0),
                                   pipeline_mode=pl.Buffered(1))],
            out_specs=pl.BlockSpec((8, 128), lambda i: (0, 0)),
        )(jnp.zeros((8, 128), jnp.float32))
        jax.block_until_ready(out)
        _SINGLE_BUFFER_OK = True
    except Exception:
        _SINGLE_BUFFER_OK = False
    return _SINGLE_BUFFER_OK


# ---------------------------------------------------------------------------
# Kernels
# ---------------------------------------------------------------------------
def _layernorm(h2, gamma, beta, f_mid, eps):
    """Fused single-pass LayerNorm over the real f_mid features (padded cols
    are exactly zero and gamma/beta are zero there, so they stay zero)."""
    inv_f = 1.0 / f_mid
    s1 = jnp.sum(h2, axis=-1, keepdims=True)
    s2 = jnp.sum(h2 * h2, axis=-1, keepdims=True)
    mean = s1 * inv_f
    var = jnp.maximum(s2 * inv_f - mean * mean, 0.0)   # guard f32 cancellation
    scale = gamma * lax.rsqrt(var + eps)               # gamma folded into rsqrt
    return (h2 - mean) * scale + beta


def _resident_kernel(f_mid, eps,
                     x_ref, w1_ref, b1_ref, w2_ref, b2_ref,
                     gamma_ref, beta_ref, w3_ref, b3_ref, o_ref):
    """All weights resident: Linear -> ReLU -> Linear -> ReLU -> LN -> Linear."""
    wdt = w1_ref.dtype                       # matmul operand dtype (f32/bf16)
    x = x_ref[...]

    h1 = jnp.dot(x.astype(wdt), w1_ref[...], preferred_element_type=jnp.float32)
    h1 = jnp.maximum(h1 + b1_ref[...], 0.0)

    h2 = jnp.dot(h1.astype(wdt), w2_ref[...], preferred_element_type=jnp.float32)
    h2 = jnp.maximum(h2 + b2_ref[...], 0.0)

    hn = _layernorm(h2, gamma_ref[...], beta_ref[...], f_mid, eps)

    o_ref[...] = (jnp.dot(hn.astype(wdt), w3_ref[...],
                          preferred_element_type=jnp.float32)
                  + b3_ref[...]).astype(o_ref.dtype)


def _streamed_kernel(f_mid, eps,
                     x_ref, w1k_ref, b1k_ref, w2k_ref, b2_ref,
                     gamma_ref, beta_ref, w3_ref, b3_ref, o_ref, acc_ref):
    """K-split path for large f_mid: w1/w2 streamed in k-slabs, f32 VMEM acc.

    h2 = relu(x@W1+b1) @ W2 = sum_k relu(x @ W1[:,k] + b1[k]) @ W2[k,:]
    (exact because ReLU is elementwise)."""
    wdt = w1k_ref.dtype
    k = pl.program_id(1)

    @pl.when(k == 0)
    def _():
        acc_ref[...] = jnp.zeros_like(acc_ref)

    h1_k = jnp.dot(x_ref[...].astype(wdt), w1k_ref[...],
                   preferred_element_type=jnp.float32)
    h1_k = jnp.maximum(h1_k + b1k_ref[...], 0.0)
    acc_ref[...] += jnp.dot(h1_k.astype(wdt), w2k_ref[...],
                            preferred_element_type=jnp.float32)

    @pl.when(k == pl.num_programs(1) - 1)
    def _():
        h2 = jnp.maximum(acc_ref[...] + b2_ref[...], 0.0)
        hn = _layernorm(h2, gamma_ref[...], beta_ref[...], f_mid, eps)
        o_ref[...] = (jnp.dot(hn.astype(wdt), w3_ref[...],
                              preferred_element_type=jnp.float32)
                      + b3_ref[...]).astype(o_ref.dtype)


# ---------------------------------------------------------------------------
# Wrapper
# ---------------------------------------------------------------------------
def prepare_params(params, *, weight_dtype=jnp.bfloat16):
    """Pad feature dims to multiples of 128 and cast weights ONCE (hoisted
    out of the forward path). Padded LN columns get gamma=beta=0 so results
    match the unpadded reference exactly."""
    f_in, f_mid = params["w1"].shape
    f_out = params["w3"].shape[1]
    f_mid_p = _round_up(f_mid, 128)
    f_out_p = _round_up(f_out, 128)

    def pad2(a, rows, cols):
        pr, pc = rows - a.shape[0], cols - a.shape[1]
        if pr == 0 and pc == 0:
            return a
        return jnp.pad(a, ((0, pr), (0, pc)))

    prepared = dict(
        w1=pad2(params["w1"], f_in, f_mid_p).astype(weight_dtype),
        w2=pad2(params["w2"], f_mid_p, f_mid_p).astype(weight_dtype),
        w3=pad2(params["w3"], f_mid_p, f_out_p).astype(weight_dtype),
        b1=pad2(params["b1"], 1, f_mid_p),
        b2=pad2(params["b2"], 1, f_mid_p),
        b3=pad2(params["b3"], 1, f_out_p),
        gamma=pad2(params["gamma"], 1, f_mid_p),
        beta=pad2(params["beta"], 1, f_mid_p),
    )
    meta = dict(f_in=f_in, f_mid=f_mid, f_out=f_out,
                f_mid_p=f_mid_p, f_out_p=f_out_p, weight_dtype=weight_dtype)
    return prepared, meta


def _cost_estimate(B_p, f_in, f_mid_p, f_out_p, itemsize):
    try:
        flops = 2 * B_p * (f_in * f_mid_p + f_mid_p * f_mid_p + f_mid_p * f_out_p)
        bytes_accessed = (4 * B_p * (f_in + f_out_p)
                          + itemsize * (f_in * f_mid_p + f_mid_p * f_mid_p
                                        + f_mid_p * f_out_p)
                          + 4 * 6 * f_mid_p)
        return pl.CostEstimate(flops=flops, transcendentals=B_p,
                               bytes_accessed=bytes_accessed)
    except Exception:
        return None


def _forward(x, p, *, meta, max_tile_b=None, w2_stream_bytes=None,
             stream_k_tile=512):
    B, f_in = x.shape
    assert f_in == meta["f_in"], "x feature dim does not match params"
    f_mid, f_mid_p, f_out, f_out_p = (meta["f_mid"], meta["f_mid_p"],
                                      meta["f_out"], meta["f_out_p"])
    itemsize = jnp.dtype(meta["weight_dtype"]).itemsize

    vmem_limit = _vmem_limit_bytes()
    single_buf = _single_buffer_supported()

    # ---- decide resident vs. streamed w2 ------------------------------------
    w2_bytes = f_mid_p * f_mid_p * itemsize
    resident_w2_cost = w2_bytes * (1 if single_buf else 2)
    threshold = vmem_limit // 3 if w2_stream_bytes is None else w2_stream_bytes
    stream_w2 = resident_w2_cost > threshold

    if stream_w2:
        tk = max(128, (min(stream_k_tile, f_mid_p) // 128) * 128)
        while f_mid_p % tk != 0:
            tk -= 128
        n_k = f_mid_p // tk
        weight_resident = itemsize * (2 * (f_in * tk + tk * f_mid_p)
                                      + f_mid_p * f_out_p + 6 * f_mid_p)
    else:
        tk, n_k = f_mid_p, 1
        weight_resident = itemsize * (f_in * f_mid_p + f_mid_p * f_mid_p
                                      + f_mid_p * f_out_p + 6 * f_mid_p)
        if not single_buf:
            weight_resident *= 2

    # ---- batch tiling: balanced tiles sized from the VMEM budget ------------
    if max_tile_b is None:
        per_row = 4 * (2 * f_in + 4 * f_mid_p + 2 * f_out_p)
        budget = max(vmem_limit - weight_resident - 8 * 1024 * 1024,
                     1 * 1024 * 1024)
        max_tile_b = max(8, min(1024, (budget // per_row) // 8 * 8))
    n_b = _cdiv(B, max_tile_b)
    tile_b = _round_up(_cdiv(B, n_b), 8)
    B_p = _round_up(B, tile_b)
    n_b = B_p // tile_b

    xp = x if B_p == B else jnp.pad(x, ((0, B_p - B), (0, 0)))
    cost = _cost_estimate(B_p, f_in, f_mid_p, f_out_p, itemsize)

    def const_spec(shape, grid_rank):
        idx = (lambda i: (0, 0)) if grid_rank == 1 else (lambda i, k: (0, 0))
        if single_buf:
            return pl.BlockSpec(shape, idx, pipeline_mode=pl.Buffered(1))
        return pl.BlockSpec(shape, idx)

    args = (xp, p["w1"], p["b1"], p["w2"], p["b2"],
            p["gamma"], p["beta"], p["w3"], p["b3"])

    if not stream_w2:
        row_map = lambda i: (i, 0)
        kernel = functools.partial(_resident_kernel, float(f_mid), LN_EPS)
        out = pl.pallas_call(
            kernel,
            out_shape=jax.ShapeDtypeStruct((B_p, f_out_p), jnp.float32),
            grid_spec=pltpu.PrefetchScalarGridSpec(
                num_scalar_prefetch=0,
                grid=(n_b,),
                in_specs=[
                    pl.BlockSpec((tile_b, f_in), row_map),   # x tile (no lane pad)
                    const_spec((f_in, f_mid_p), 1),          # w1
                    const_spec((1, f_mid_p), 1),             # b1
                    const_spec((f_mid_p, f_mid_p), 1),       # w2
                    const_spec((1, f_mid_p), 1),             # b2
                    const_spec((1, f_mid_p), 1),             # gamma
                    const_spec((1, f_mid_p), 1),             # beta
                    const_spec((f_mid_p, f_out_p), 1),       # w3
                    const_spec((1, f_out_p), 1),             # b3
                ],
                out_specs=pl.BlockSpec((tile_b, f_out_p), row_map),
            ),
            compiler_params=pltpu.CompilerParams(
                dimension_semantics=("parallel",),
                vmem_limit_bytes=vmem_limit),
            cost_estimate=cost,
        )(*args)
    else:
        row_map = lambda i, k: (i, 0)
        kernel = functools.partial(_streamed_kernel, float(f_mid), LN_EPS)
        out = pl.pallas_call(
            kernel,
            out_shape=jax.ShapeDtypeStruct((B_p, f_out_p), jnp.float32),
            grid_spec=pltpu.PrefetchScalarGridSpec(
                num_scalar_prefetch=0,
                grid=(n_b, n_k),
                in_specs=[
                    pl.BlockSpec((tile_b, f_in), row_map),           # x tile
                    pl.BlockSpec((f_in, tk), lambda i, k: (0, k)),   # w1 slab
                    pl.BlockSpec((1, tk), lambda i, k: (0, k)),      # b1 slab
                    pl.BlockSpec((tk, f_mid_p), lambda i, k: (k, 0)),  # w2 slab
                    const_spec((1, f_mid_p), 2),                     # b2
                    const_spec((1, f_mid_p), 2),                     # gamma
                    const_spec((1, f_mid_p), 2),                     # beta
                    const_spec((f_mid_p, f_out_p), 2),               # w3
                    const_spec((1, f_out_p), 2),                     # b3
                ],
                out_specs=pl.BlockSpec((tile_b, f_out_p), row_map),
                scratch_shapes=[pltpu.VMEM((tile_b, f_mid_p), jnp.float32)],
            ),
            compiler_params=pltpu.CompilerParams(
                dimension_semantics=("parallel", "arbitrary"),
                vmem_limit_bytes=vmem_limit),
            cost_estimate=cost,
        )(*args)

    return out[:B, :f_out]


def make_simple_iteration(params, *, weight_dtype=jnp.bfloat16, max_tile_b=None,
                          w2_stream_bytes=None, stream_k_tile=512):
    """Returns a jitted forward closure over padded/cast params."""
    _single_buffer_supported()          # probe once, eagerly, outside jit
    prepared, meta = prepare_params(params, weight_dtype=weight_dtype)
    impl = functools.partial(_forward, meta=meta, max_tile_b=max_tile_b,
                             w2_stream_bytes=w2_stream_bytes,
                             stream_k_tile=stream_k_tile)
    jitted = jax.jit(impl)
    return lambda x: jitted(x, prepared)


# ---------------------------------------------------------------------------
# Reference / init
# ---------------------------------------------------------------------------
def init_params(key, f_in, f_mid, f_out):
    """Deterministic synthetic init mirroring nn.Linear / nn.LayerNorm shapes."""
    ks = jax.random.split(key, 6)

    def linear(kw, kb, fan_in, fan_out):
        bound = 1.0 / jnp.sqrt(fan_in)
        w = jax.random.uniform(kw, (fan_in, fan_out), jnp.float32, -bound, bound)
        b = jax.random.uniform(kb, (1, fan_out), jnp.float32, -bound, bound)
        return w, b

    w1, b1 = linear(ks[0], ks[1], f_in, f_mid)
    w2, b2 = linear(ks[2], ks[3], f_mid, f_mid)
    w3, b3 = linear(ks[4], ks[5], f_mid, f_out)
    gamma = jnp.ones((1, f_mid), jnp.float32)
    beta = jnp.zeros((1, f_mid), jnp.float32)
    return dict(w1=w1, b1=b1, w2=w2, b2=b2, gamma=gamma, beta=beta,
                w3=w3, b3=b3)


def reference(x, p):
    h1 = jnp.maximum(x @ p["w1"] + p["b1"], 0.0)
    h2 = jnp.maximum(h1 @ p["w2"] + p["b2"], 0.0)
    mean = jnp.mean(h2, axis=-1, keepdims=True)
    var = jnp.mean((h2 - mean) ** 2, axis=-1, keepdims=True)
    hn = (h2 - mean) / jnp.sqrt(var + LN_EPS) * p["gamma"] + p["beta"]
    return hn @ p["w3"] + p["b3"]


if __name__ == "__main__":
    key = jax.random.PRNGKey(0)
    k_p, k_x, k_x2, k_p3, k_x3 = jax.random.split(key, 5)

    # Case 1: f32 matmul operands, small batch -> one grid step, tight check.
    f_in, f_mid, f_out = 32, 64, 32
    params = init_params(k_p, f_in, f_mid, f_out)
    fwd_f32 = make_simple_iteration(params, weight_dtype=jnp.float32)
    B = 16
    x = jax.random.normal(k_x, (B, f_in), jnp.float32)
    out = jax.block_until_ready(fwd_f32(x))
    ref = reference(x, params)
    assert out.shape == (B, f_out)
    assert jnp.allclose(out, ref, atol=1e-4, rtol=1e-4), "f32 case mismatch"

    # Case 2: default bf16 matmul operands, non-multiple batch (balanced tile).
    fwd_bf16 = make_simple_iteration(params)
    B2 = 300
    x2 = jax.random.normal(k_x2, (B2, f_in), jnp.float32)
    out2 = jax.block_until_ready(fwd_bf16(x2))
    ref2 = reference(x2, params)
    assert out2.shape == (B2, f_out)
    assert jnp.allclose(out2, ref2, atol=5e-2, rtol=5e-2), "bf16 case mismatch"

    # Case 3: force the K-split (streamed w2) path used for large f_mid on v7x.
    f_in3, f_mid3, f_out3 = 32, 256, 32
    params3 = init_params(k_p3, f_in3, f_mid3, f_out3)
    fwd_stream = make_simple_iteration(params3, weight_dtype=jnp.float32,
                                       w2_stream_bytes=0, stream_k_tile=128)
    B3 = 40
    x3 = jax.random.normal(k_x3, (B3, f_in3), jnp.float32)
    out3 = jax.block_until_ready(fwd_stream(x3))
    ref3 = reference(x3, params3)
    assert out3.shape == (B3, f_out3)
    assert jnp.allclose(out3, ref3, atol=1e-3, rtol=1e-3), "streamed case mismatch"

    print("KERNEL_OK")
</pallas_src>

<mosaic_0001>
module attributes {stable_mosaic.version = 11 : i64} {
  func.func @_probe_kernel(%arg0: i32, %arg1: memref<8x128xf32, #tpu.memory_space<vmem>>, %arg2: memref<8x128xf32, #tpu.memory_space<vmem>>) attributes {dimension_semantics = [#tpu.dimension_semantics<arbitrary>], iteration_bounds = array<i64: 2>, scalar_prefetch = 0 : i64, scratch_operands = 0 : i64, tpu.core_type = #tpu.core_type<tc>, window_params = [{pipeline_mode = #tpu.pipeline_mode<synchronous>, transform_indices = @transform_0, window_bounds = array<i64: 8, 128>}, {pipeline_mode = #tpu.pipeline_mode<synchronous>, transform_indices = @transform_1, window_bounds = array<i64: 8, 128>}]} {
    %c0 = arith.constant 0 : index
    %c0_0 = arith.constant 0 : index
    %0 = vector.load %arg1[%c0, %c0_0] : memref<8x128xf32, #tpu.memory_space<vmem>>, vector<8x128xf32>
    %cst = arith.constant 1.000000e+00 : f32
    %1 = vector.broadcast %cst : f32 to vector<8x128xf32>
    %2 = arith.addf %0, %1 : vector<8x128xf32>
    %c0_1 = arith.constant 0 : index
    %c0_2 = arith.constant 0 : index
    %3 = vector.load %arg2[%c0_1, %c0_2] : memref<8x128xf32, #tpu.memory_space<vmem>>, vector<8x128xf32>
    tpu.vector_store %arg2[%c0_1, %c0_2], %2 {strides = array<i32>} : memref<8x128xf32, #tpu.memory_space<vmem>>, vector<8x128xf32>,
    return
  }
  func.func @transform_0(%arg0: i32) -> (i32, i32) {
    %c0_i32 = arith.constant 0 : i32
    %c0_i32_0 = arith.constant 0 : i32
    %c0_i32_1 = arith.constant 0 : i32
    return %c0_i32, %c0_i32_0 : i32, i32
  }
  func.func @transform_1(%arg0: i32) -> (i32, i32) {
    %c0_i32 = arith.constant 0 : i32
    %c0_i32_0 = arith.constant 0 : i32
    %c0_i32_1 = arith.constant 0 : i32
    return %c0_i32, %c0_i32_0 : i32, i32
  }
}

module attributes {stable_mosaic.version = 11 : i64} {
  func.func @_resident_kernel(%arg0: i32, %arg1: memref<16x32xf32, #tpu.memory_space<vmem>>, %arg2: memref<32x128xf32, #tpu.memory_space<vmem>>, %arg3: memref<1x128xf32, #tpu.memory_space<vmem>>, %arg4: memref<128x128xf32, #tpu.memory_space<vmem>>, %arg5: memref<1x128xf32, #tpu.memory_space<vmem>>, %arg6: memref<1x128xf32, #tpu.memory_space<vmem>>, %arg7: memref<1x128xf32, #tpu.memory_space<vmem>>, %arg8: memref<128x128xf32, #tpu.memory_space<vmem>>, %arg9: memref<1x128xf32, #tpu.memory_space<vmem>>, %arg10: memref<16x128xf32, #tpu.memory_space<vmem>>) attributes {dimension_semantics = [#tpu.dimension_semantics<parallel>], iteration_bounds = array<i64: 1>, scalar_prefetch = 0 : i64, scratch_operands = 0 : i64, tpu.core_type = #tpu.core_type<tc>, window_params = [{transform_indices = @transform_0, window_bounds = array<i64: 16, 32>}, {pipeline_mode = #tpu.pipeline_mode<synchronous>, transform_indices = @transform_1, window_bounds = array<i64: 32, 128>}, {pipeline_mode = #tpu.pipeline_mode<synchronous>, transform_indices = @transform_2, window_bounds = array<i64: 1, 128>}, {pipeline_mode = #tpu.pipeline_mode<synchronous>, transform_indices = @transform_3, window_bounds = array<i64: 128, 128>}, {pipeline_mode = #tpu.pipeline_mode<synchronous>, transform_indices = @transform_4, window_bounds = array<i64: 1, 128>}, {pipeline_mode = #tpu.pipeline_mode<synchronous>, transform_indices = @transform_5, window_bounds = array<i64: 1, 128>}, {pipeline_mode = #tpu.pipeline_mode<synchronous>, transform_indices = @transform_6, window_bounds = array<i64: 1, 128>}, {pipeline_mode = #tpu.pipeline_mode<synchronous>, transform_indices = @transform_7, window_bounds = array<i64: 128, 128>}, {pipeline_mode = #tpu.pipeline_mode<synchronous>, transform_indices = @transform_8, window_bounds = array<i64: 1, 128>}, {transform_indices = @transform_9, window_bounds = array<i64: 16, 128>}]} {
    %c0 = arith.constant 0 : index
    %c0_0 = arith.constant 0 : index
    %0 = vector.load %arg1[%c0, %c0_0] : memref<16x32xf32, #tpu.memory_space<vmem>>, vector<16x32xf32>
    %c0_1 = arith.constant 0 : index
    %c0_2 = arith.constant 0 : index
    %1 = vector.load %arg2[%c0_1, %c0_2] : memref<32x128xf32, #tpu.memory_space<vmem>>, vector<32x128xf32>
    %cst = arith.constant dense<0.000000e+00> : vector<16x128xf32>
    %2 = tpu.matmul %0, %1, %cst {dimension_numbers = #tpu.dot_dimension_numbers<[1], [0], [0], [1], [0, 0, 1, 1], [], []>} : vector<16x32xf32>, vector<32x128xf32>, vector<16x128xf32> -> vector<16x128xf32>
    %c0_3 = arith.constant 0 : index
    %c0_4 = arith.constant 0 : index
    %3 = vector.load %arg3[%c0_3, %c0_4] : memref<1x128xf32, #tpu.memory_space<vmem>>, vector<1x128xf32>
    %4 = vector.broadcast %3 : vector<1x128xf32> to vector<16x128xf32>
    %5 = arith.addf %2, %4 : vector<16x128xf32>
    %cst_5 = arith.constant 0.000000e+00 : f32
    %6 = vector.broadcast %cst_5 : f32 to vector<16x128xf32>
    %7 = arith.maximumf %5, %6 : vector<16x128xf32>
    %c0_6 = arith.constant 0 : index
    %c0_7 = arith.constant 0 : index
    %8 = vector.load %arg4[%c0_6, %c0_7] : memref<128x128xf32, #tpu.memory_space<vmem>>, vector<128x128xf32>
    %cst_8 = arith.constant dense<0.000000e+00> : vector<16x128xf32>
    %9 = tpu.matmul %7, %8, %cst_8 {dimension_numbers = #tpu.dot_dimension_numbers<[1], [0], [0], [1], [0, 0, 1, 1], [], []>} : vector<16x128xf32>, vector<128x128xf32>, vector<16x128xf32> -> vector<16x128xf32>
    %c0_9 = arith.constant 0 : index
    %c0_10 = arith.constant 0 : index
    %10 = vector.load %arg5[%c0_9, %c0_10] : memref<1x128xf32, #tpu.memory_space<vmem>>, vector<1x128xf32>
    %11 = vector.broadcast %10 : vector<1x128xf32> to vector<16x128xf32>
    %12 = arith.addf %9, %11 : vector<16x128xf32>
    %cst_11 = arith.constant 0.000000e+00 : f32
    %13 = vector.broadcast %cst_11 : f32 to vector<16x128xf32>
    %14 = arith.maximumf %12, %13 : vector<16x128xf32>
    %c0_12 = arith.constant 0 : index
    %c0_13 = arith.constant 0 : index
    %15 = vector.load %arg6[%c0_12, %c0_13] : memref<1x128xf32, #tpu.memory_space<vmem>>, vector<1x128xf32>
    %c0_14 = arith.constant 0 : index
    %c0_15 = arith.constant 0 : index
    %16 = vector.load %arg7[%c0_14, %c0_15] : memref<1x128xf32, #tpu.memory_space<vmem>>, vector<1x128xf32>
    %cst_16 = arith.constant dense<0.000000e+00> : vector<16xf32>
    %17 = vector.multi_reduction <add>, %14, %cst_16 [1] : vector<16x128xf32> to vector<16xf32>
    %18 = vector.shape_cast %17 : vector<16xf32> to vector<16x1xf32>
    %19 = arith.mulf %14, %14 : vector<16x128xf32>
    %cst_17 = arith.constant dense<0.000000e+00> : vector<16xf32>
    %20 = vector.multi_reduction <add>, %19, %cst_17 [1] : vector<16x128xf32> to vector<16xf32>
    %21 = vector.shape_cast %20 : vector<16xf32> to vector<16x1xf32>
    %cst_18 = arith.constant 1.562500e-02 : f32
    %22 = vector.broadcast %cst_18 : f32 to vector<16x1xf32>
    %23 = arith.mulf %18, %22 : vector<16x1xf32>
    %cst_19 = arith.constant 1.562500e-02 : f32
    %24 = vector.broadcast %cst_19 : f32 to vector<16x1xf32>
    %25 = arith.mulf %21, %24 : vector<16x1xf32>
    %26 = arith.mulf %23, %23 : vector<16x1xf32>
    %27 = arith.subf %25, %26 : vector<16x1xf32>
    %cst_20 = arith.constant 0.000000e+00 : f32
    %28 = vector.broadcast %cst_20 : f32 to vector<16x1xf32>
    %29 = arith.maximumf %27, %28 : vector<16x1xf32>
    %cst_21 = arith.constant 9.99999974E-6 : f32
    %30 = vector.broadcast %cst_21 : f32 to vector<16x1xf32>
    %31 = arith.addf %29, %30 : vector<16x1xf32>
    %32 = math.rsqrt %31 : vector<16x1xf32>
    %33 = vector.broadcast %15 : vector<1x128xf32> to vector<16x128xf32>
    %34 = vector.broadcast %32 : vector<16x1xf32> to vector<16x128xf32>
    %35 = arith.mulf %33, %34 : vector<16x128xf32>
    %36 = vector.broadcast %23 : vector<16x1xf32> to vector<16x128xf32>
    %37 = arith.subf %14, %36 : vector<16x128xf32>
    %38 = arith.mulf %37, %35 : vector<16x128xf32>
    %39 = vector.broadcast %16 : vector<1x128xf32> to vector<16x128xf32>
    %40 = arith.addf %38, %39 : vector<16x128xf32>
    %c0_22 = arith.constant 0 : index
    %c0_23 = arith.constant 0 : index
    %41 = vector.load %arg8[%c0_22, %c0_23] : memref<128x128xf32, #tpu.memory_space<vmem>>, vector<128x128xf32>
    %cst_24 = arith.constant dense<0.000000e+00> : vector<16x128xf32>
    %42 = tpu.matmul %40, %41, %cst_24 {dimension_numbers = #tpu.dot_dimension_numbers<[1], [0], [0], [1], [0, 0, 1, 1], [], []>} : vector<16x128xf32>, vector<128x128xf32>, vector<16x128xf32> -> vector<16x128xf32>
    %c0_25 = arith.constant 0 : index
    %c0_26 = arith.constant 0 : index
    %43 = vector.load %arg9[%c0_25, %c0_26] : memref<1x128xf32, #tpu.memory_space<vmem>>, vector<1x128xf32>
    %44 = vector.broadcast %43 : vector<1x128xf32> to vector<16x128xf32>
    %45 = arith.addf %42, %44 : vector<16x128xf32>
    %c0_27 = arith.constant 0 : index
    %c0_28 = arith.constant 0 : index
    %46 = vector.load %arg10[%c0_27, %c0_28] : memref<16x128xf32, #tpu.memory_space<vmem>>, vector<16x128xf32>
    tpu.vector_store %arg10[%c0_27, %c0_28], %45 {strides = array<i32>} : memref<16x128xf32, #tpu.memory_space<vmem>>, vector<16x128xf32>,
    return
  }
  func.func @transform_0(%arg0: i32) -> (i32, i32) {
    %c0_i32 = arith.constant 0 : i32
    %c0_i32_0 = arith.constant 0 : i32
    return %arg0, %c0_i32 : i32, i32
  }
  func.func @transform_1(%arg0: i32) -> (i32, i32) {
    %c0_i32 = arith.constant 0 : i32
    %c0_i32_0 = arith.constant 0 : i32
    %c0_i32_1 = arith.constant 0 : i32
    return %c0_i32, %c0_i32_0 : i32, i32
  }
  func.func @transform_2(%arg0: i32) -> (i32, i32) {
    %c0_i32 = arith.constant 0 : i32
    %c0_i32_0 = arith.constant 0 : i32
    %c0_i32_1 = arith.constant 0 : i32
    return %c0_i32, %c0_i32_0 : i32, i32
  }
  func.func @transform_3(%arg0: i32) -> (i32, i32) {
    %c0_i32 = arith.constant 0 : i32
    %c0_i32_0 = arith.constant 0 : i32
    %c0_i32_1 = arith.constant 0 : i32
    return %c0_i32, %c0_i32_0 : i32, i32
  }
  func.func @transform_4(%arg0: i32) -> (i32, i32) {
    %c0_i32 = arith.constant 0 : i32
    %c0_i32_0 = arith.constant 0 : i32
    %c0_i32_1 = arith.constant 0 : i32
    return %c0_i32, %c0_i32_0 : i32, i32
  }
  func.func @transform_5(%arg0: i32) -> (i32, i32) {
    %c0_i32 = arith.constant 0 : i32
    %c0_i32_0 = arith.constant 0 : i32
    %c0_i32_1 = arith.constant 0 : i32
    return %c0_i32, %c0_i32_0 : i32, i32
  }
  func.func @transform_6(%arg0: i32) -> (i32, i32) {
    %c0_i32 = arith.constant 0 : i32
    %c0_i32_0 = arith.constant 0 : i32
    %c0_i32_1 = arith.constant 0 : i32
    return %c0_i32, %c0_i32_0 : i32, i32
  }
  func.func @transform_7(%arg0: i32) -> (i32, i32) {
    %c0_i32 = arith.constant 0 : i32
    %c0_i32_0 = arith.constant 0 : i32
    %c0_i32_1 = arith.constant 0 : i32
    return %c0_i32, %c0_i32_0 : i32, i32
  }
  func.func @transform_8(%arg0: i32) -> (i32, i32) {
    %c0_i32 = arith.constant 0 : i32
    %c0_i32_0 = arith.constant 0 : i32
    %c0_i32_1 = arith.constant 0 : i32
    return %c0_i32, %c0_i32_0 : i32, i32
  }
  func.func @transform_9(%arg0: i32) -> (i32, i32) {
    %c0_i32 = arith.constant 0 : i32
    %c0_i32_0 = arith.constant 0 : i32
    return %arg0, %c0_i32 : i32, i32
  }
}

</mosaic_0001>

<bundles_post_ra>
// kernel: tpu_custom_call.1
= control target key start
LH: loop header
LB: loop body
LE: loop exit
PB: predicated region body
PF: predicated region fallthrough
CT: control target
= control target key end

     0   :  { %6 = vsyncpa [#allocation3], 0  ;;  %s341_s0 = inlined_call_operand.hbm [shape: f32[8,128], index: 0, kind: input, shape index: {}]   ;;  %s342_s1 = inlined_call_operand.hbm [shape: f32[8,128], index: 1, kind: output, shape index: {}]  }
   0x1   :  { %7 = vsyncpa [#allocation4], 0  ;;  %s262_s6 = smov 0  }
   0x2 LB: > { %s145_s7 = sadd.s32 4294967295, %s248_s6   ;;  %p146_p0 = scmp.ge.s32.totalorder %s248_s6, 1  ;;  %s248_s6 = sphi %s262_s6, %s13_s6  }
   0x3   : > { %p60_p1 = scmp.lt.s32.totalorder %s248_s6, 3  ;;  %p276_p3 = scmp.eq.s32.totalorder %s145_s7, 0 }
   0x4   : > { %s250_s10 = smov [#allocation2]   ;;  %s180_s15 = scalar_lea.hbm %s341_s0, 128 }
   0x5   : > { %p270_p2 = pnand %p146_p0, %p60_p1  ;;  %s73_s11 = sshll.u32 %s250_s10, 4  ;;  %s74_s11 = int_to_ptr.vmem [resolvable:$true] %s73_s11 }
   0x6   : > { %s347_s9 = scalar_select %p276_p3, 1, 0 }
   0x7   : > { %s346_s8 = scalar_select %p270_p2, 1, 0 }
   0x8   : > { %p162_p4 = pneg %p270_p2  ;;  %p181_p6 = scmp.ne.s32.totalorder %s341_s0, %s180_s15 }
   0x9   : > { %p187_p10 = scmp.lt.u32.totalorder %s180_s15, %s341_s0 }
   0xa   : > { %p284_p5 = pnand %p276_p3, %p162_p4 }
   0xc   : > { %p182_p7 = pneg %p284_p5 }
   0xe   : > { %p183_p8 = pnand %p182_p7, %p181_p6 }
  0x10   : > { %p184_p9 = pneg %p183_p8 }
  0x12   : > { %p189_p11 = pnand %p187_p10, %p184_p9 }
  0x14   : > { %192 = shalt.err (!%p189_p11)
}
  0x15   : > { %s193_s20 = scalar_lea.vmem %s74_s11, 128  ;;  %p201_p1 = scmp.lt.s32.totalorder %s74_s11, %s74_s11 }
  0x16   : > { %p194_p12 = scmp.ne.s32.totalorder %s74_s11, %s193_s20  ;;  %p202_p4 = scmp.lt.s32.totalorder %s193_s20, %s193_s20 }
  0x18   : > { %p196_p13 = pnand %p194_p12, %p182_p7  ;;  %p203_p3 = por %p202_p4, %p201_p1 }
  0x1a   : > { %p197_p0 = pneg %p196_p13 }
  0x1c   : > { %p204_p2 = pnand %p203_p3, %p197_p0 }
  0x1e   : > { %207 = shalt.err (!%p204_p2)
}
  0x1f   : > { %165 = dma.hbm_to_vmem [thread:$0]  (!%p284_p5), %s341_s0, 128, %s74_s11, [#allocation3]  }
  0x20   : > { %p349_p6 = scmp.ne.s32.totalorder %s346_s8, 0 }
  0x21   : > { %p350_p8 = scmp.ne.s32.totalorder (!%p349_p6), %s347_s9, 0 }
  0x22   : > { %86 = sbr.rel (%p349_p6) target bundleno = 67 (0x43), region = 24 }
  0x29   : > { %239 = dma.done.wait (%p350_p8), [#allocation3], 128  }
  0x2a   : > { %241 = vsyncadd (%p350_p8), [#allocation3], 4294967168  ;;  %s251_s23 = smov [#allocation5]   ;;  %v96_v0 = vld [vmem:[#allocation2] sm:$0xff]  ;;  %p312_p2 = scmp.eq.s32.totalorder %s145_s7, 1 }
  0x2b   : > { %s106_s24 = sshll.u32 %s251_s23, 4  ;;  %v97_v1 = vadd.f32 1.0, %v96_v0  ;;  %s107_s24 = int_to_ptr.vmem [resolvable:$true] %s106_s24 }
  0x2c   : > { %s208_s26 = scalar_lea.vmem %s107_s24, 128  ;;  %p215_p9 = scmp.lt.s32.totalorder %s107_s24, %s107_s24 }
  0x2d   : > { %98 = vst [vmem:[#allocation5] sm:$0xff] %v97_v1  ;;  %p209_p3 = scmp.ne.s32.totalorder %s107_s24, %s208_s26  ;;  %p216_p10 = scmp.lt.s32.totalorder %s208_s26, %s208_s26 }
  0x2f   : > { %p210_p5 = pnand %p209_p3, %p312_p2  ;;  %p217_p11 = por %p216_p10, %p215_p9 }
  0x31   : > { %p211_p7 = pneg %p210_p5 }
  0x33   : > { %p218_p12 = pnand %p217_p11, %p211_p7 }
  0x35   : > { %221 = shalt.err (!%p218_p12)
}
  0x36   : > { %s222_s29 = scalar_lea.hbm %s342_s1, 128 }
  0x37   : > { %p223_p13 = scmp.ne.s32.totalorder %s342_s1, %s222_s29  ;;  %p228_p4 = scmp.lt.u32.totalorder %s222_s29, %s342_s1 }
  0x39   : > { %p224_p0 = pnand %p223_p13, %p312_p2 }
  0x3b   : > { %p225_p1 = pneg %p224_p0 }
  0x3d   : > { %p230_p6 = pnand %p228_p4, %p225_p1 }
  0x3f   : > { %233 = shalt.err (!%p230_p6)
}
  0x40   : > { %159 = dma.vmem_to_hbm [thread:$0]  (%p312_p2), %s107_s24, 128, %s342_s1, [#allocation4]  }
  0x41   : > { %243 = dma.done.wait (%p312_p2), [#allocation4], 128  }
  0x42   : > { %245 = vsyncadd (%p312_p2), [#allocation4], 4294967168 }
  0x43 PF: > { %s13_s6 = sadd.s32 1, %s248_s6  }
  0x44   : > { %p10_p8 = scmp.ge.s32.totalorder %s13_s6, 4  }
  0x46   :  { %12 = sbr.rel (!%p10_p8) target bundleno = 2 (0x2), region = 53 }
  0x4d   :  { %119 = vsyncpa [#allocation3], 1 }
  0x4e   :  { %121 = vsyncpa [#allocation3 + $0x1], 1 }
  0x4f   :  { %122 = vsyncpa [#allocation4], 1 }
  0x50   :  { %124 = vsyncpa [#allocation4 + $0x1], 1 }

// kernel: _forward.1
= control target key start
LH: loop header
LB: loop body
LE: loop exit
PB: predicated region body
PF: predicated region fallthrough
CT: control target
= control target key end

     0   :  { %14 = vsyncpa [#allocation3], 0  ;;  %s956_s0 = inlined_call_operand.hbm [shape: f32[16,32], index: 0, kind: input, shape index: {}]   ;;  %s957_s1 = inlined_call_operand.hbm [shape: f32[32,128], index: 1, kind: input, shape index: {}]   ;;  %s958_s2 = inlined_call_operand.vmem [shape: f32[1,128], index: 2, kind: input, shape index: {}]   ;;  %s959_s3 = inlined_call_operand.hbm [shape: f32[128,128], index: 3, kind: input, shape index: {}]   ;;  %s960_s4 = inlined_call_operand.vmem [shape: f32[1,128], index: 4, kind: input, shape index: {}]   ;;  %s961_s5 = inlined_call_operand.vmem [shape: f32[1,128], index: 5, kind: input, shape index: {}]   ;;  %s962_s6 = inlined_call_operand.vmem [shape: f32[1,128], index: 6, kind: input, shape index: {}]   ;;  %s963_s7 = inlined_call_operand.hbm [shape: f32[128,128], index: 7, kind: input, shape index: {}]   ;;  %s964_s8 = inlined_call_operand.vmem [shape: f32[1,128], index: 8, kind: input, shape index: {}]   ;;  %s965_s9 = inlined_call_operand.hbm [shape: f32[16,128], index: 9, kind: output, shape index: {}]  }
   0x1   :  { %15 = vsyncpa [#allocation6], 0 }
   0x2   :  { %16 = vsyncpa [#allocation9], 0 }
   0x3   :  { %17 = vsyncpa [#allocation4], 0  ;;  %s781_s30 = smov [#allocation5]   ;;  %s782_s11 = smov [#allocation2]  }
   0x4   :  { %s35_s10 = sshll.u32 %s781_s30, 4  ;;  %s23_s12 = sshll.u32 %s782_s11, 4  ;;  %s36_s10 = int_to_ptr.vmem [resolvable:$true] %s35_s10  ;;  %s838_s12 = int_to_ptr.vmem [resolvable:$true] %s23_s12 }
   0x5   :  { %s663_s15 = scalar_lea.hbm %s957_s1, 512 }
   0x6   :  { %p664_p0 = scmp.ne.s32.totalorder %s957_s1, %s663_s15  ;;  %p667_p1 = scmp.lt.u32.totalorder %s663_s15, %s957_s1 }
   0x8   :  { %p669_p2 = pnand %p667_p1, %p664_p0 }
   0xa   :  { %672 = shalt.err (!%p669_p2)
}
   0xb   :  { %s673_s20 = scalar_lea.vmem %s36_s10, 512  ;;  %p678_p4 = scmp.lt.s32.totalorder %s36_s10, %s36_s10 }
   0xc   :  { %p674_p3 = scmp.ne.s32.totalorder %s36_s10, %s673_s20  ;;  %p679_p5 = scmp.lt.s32.totalorder %s673_s20, %s673_s20 }
   0xe   :  { %p680_p6 = por %p679_p5, %p678_p4 }
  0x10   :  { %p681_p7 = pnand %p680_p6, %p674_p3 }
  0x12   :  { %684 = shalt.err (!%p681_p7)
}
  0x13   :  { %s783_s21 = smov 128   ;;  %s784_s22 = smov 8  }
  0x14   :  { %41 = dma.hbm_to_vmem [thread:$0]  %s957_s1, 512, %s36_s10, [#allocation6], %s783_s21, %s783_s21, %s784_s22  }
  0x15   :  { %s685_s27 = scalar_lea.hbm %s956_s0, 256 }
  0x16   :  { %p686_p8 = scmp.ne.s32.totalorder %s956_s0, %s685_s27  ;;  %p689_p9 = scmp.lt.u32.totalorder %s685_s27, %s956_s0 }
  0x18   :  { %p691_p10 = pnand %p689_p9, %p686_p8 }
  0x1a   :  { %694 = shalt.err (!%p691_p10)
}
  0x1b   :  { %s695_s13 = scalar_lea.vmem %s838_s12, 256  ;;  %p700_p12 = scmp.lt.s32.totalorder %s838_s12, %s838_s12 }
  0x1c   :  { %p696_p11 = scmp.ne.s32.totalorder %s838_s12, %s695_s13  ;;  %p701_p13 = scmp.lt.s32.totalorder %s695_s13, %s695_s13 }
  0x1e   :  { %p702_p0 = por %p701_p13, %p700_p12 }
  0x20   :  { %p703_p1 = pnand %p702_p0, %p696_p11 }
  0x22   :  { %706 = shalt.err (!%p703_p1)
}
  0x23   :  { %29 = dma.hbm_to_vmem [thread:$0]  %s956_s0, 256, %s838_s12, [#allocation3], %s783_s21, %s783_s21, %s784_s22  }
  0x24   :  { %s785_s14 = smov [#allocation7]   ;;  %s786_s16 = smov [#allocation8]  }
  0x25   :  { %s49_s15 = sshll.u32 %s785_s14, 4  ;;  %s67_s17 = sshll.u32 %s786_s16, 4  ;;  %s50_s15 = int_to_ptr.vmem [resolvable:$true] %s49_s15  ;;  %s875_s17 = int_to_ptr.vmem [resolvable:$true] %s67_s17 }
  0x26   :  { %s707_s20 = scalar_lea.hbm %s959_s3, 2048 }
  0x27   :  { %p708_p2 = scmp.ne.s32.totalorder %s959_s3, %s707_s20  ;;  %p711_p3 = scmp.lt.u32.totalorder %s707_s20, %s959_s3 }
  0x29   :  { %p713_p4 = pnand %p711_p3, %p708_p2 }
  0x2b   :  { %716 = shalt.err (!%p713_p4)
}
  0x2c   :  { %s717_s0 = scalar_lea.vmem %s50_s15, 2048  ;;  %p722_p6 = scmp.lt.s32.totalorder %s50_s15, %s50_s15 }
  0x2d   :  { %p718_p5 = scmp.ne.s32.totalorder %s50_s15, %s717_s0  ;;  %p723_p7 = scmp.lt.s32.totalorder %s717_s0, %s717_s0 }
  0x2f   :  { %p724_p8 = por %p723_p7, %p722_p6 }
  0x31   :  { %p725_p9 = pnand %p724_p8, %p718_p5 }
  0x33   :  { %728 = shalt.err (!%p725_p9)
}
  0x34   :  { %55 = dma.hbm_to_vmem [thread:$0]  %s959_s3, 2048, %s50_s15, [#allocation6], %s783_s21, %s783_s21, %s784_s22  }
  0x35   :  { %s729_s30 = scalar_lea.hbm %s963_s7, 2048 }
  0x36   :  { %p730_p10 = scmp.ne.s32.totalorder %s963_s7, %s729_s30  ;;  %p733_p11 = scmp.lt.u32.totalorder %s729_s30, %s963_s7 }
  0x38   :  { %p735_p12 = pnand %p733_p11, %p730_p10 }
  0x3a   :  { %738 = shalt.err (!%p735_p12)
}
  0x3b   :  { %s739_s14 = scalar_lea.vmem %s875_s17, 2048  ;;  %p744_p0 = scmp.lt.s32.totalorder %s875_s17, %s875_s17 }
  0x3c   :  { %p740_p13 = scmp.ne.s32.totalorder %s875_s17, %s739_s14  ;;  %p745_p1 = scmp.lt.s32.totalorder %s739_s14, %s739_s14 }
  0x3e   :  { %p746_p2 = por %p745_p1, %p744_p0 }
  0x40   :  { %p747_p3 = pnand %p746_p2, %p740_p13 }
  0x42   :  { %750 = shalt.err (!%p747_p3)
}
  0x43   :  { %73 = dma.hbm_to_vmem [thread:$0]  %s963_s7, 2048, %s875_s17, [#allocation9], %s783_s21, %s783_s21, %s784_s22  }
  0x44   :  { %773 = dma.done.wait [#allocation3], 256  }
  0x45   :  { %774 = vsyncadd [#allocation3], 4294967040 }
  0x46   :  { %775 = dma.done.wait [#allocation6], 2560  }
  0x47   :  { %776 = vsyncadd [#allocation6], 4294964736 }
  0x48   :  { %777 = dma.done.wait [#allocation9], 2048  }
  0x49   :  { %778 = vsyncadd [#allocation9], 4294965248  ;;  %vm101_vm0 = vcmask 261120   ;;  %v90_v0 = vld [vmem:[#allocation5] sm:$0xff]  ;;  %v91_v1 = vld [vmem:[#allocation5 + $0x8] sm:$0xff]  ;;  %s787_s24 = smov [#allocation10]  }
  0x4a   :  { %v92_v2 = vld [vmem:[#allocation5 + $0x10] sm:$0xff]  ;;  %v580_v3 = vpack.c.bf16 %v91_v1, %v90_v0  ;;  %v93_v4 = vld [vmem:[#allocation5 + $0x18] sm:$0xff]  ;;  %v185_v7 = vld [vmem:[#allocation7] sm:$0xff]  ;;  %s436_s25 = sshll.u32 %s787_s24, 4  ;;  %s437_s25 = int_to_ptr.vmem [resolvable:$true] %s436_s25 }
  0x4b   :  { %v88_v5 = vld [vmem:[#allocation2] sm:$0xff]  ;;  %v584_v6 = vpack.c.bf16 %v93_v4, %v92_v2  ;;  %v186_v8 = vld [vmem:[#allocation7 + $0x8] sm:$0xff]  ;;  %v188_v11 = vld [vmem:[#allocation7 + $0x18] sm:$0xff]  ;;  %p756_p5 = scmp.lt.s32.totalorder %s437_s25, %s437_s25 }
  0x4c   :  { %507 = vmatprep.mubr.msk.f32.mxu0 %vm101_vm0, %v88_v5  ;;  %v187_v9 = vld [vmem:[#allocation7 + $0x10] sm:$0xff]  ;;  %581 = vmatprep.subr.bf16.mxu0 %v580_v3  ;;  %v588_v10 = vpack.c.bf16 %v186_v8, %v185_v7  ;;  %v189_v13 = vld [vmem:[#allocation7 + $0x20] sm:$0xff]  ;;  %v190_v14 = vld [vmem:[#allocation7 + $0x28] sm:$0xff] }
  0x4d   :  { %583 = vmatpush3.bf16.msra.mxu0 %v580_v3  ;;  %v592_v12 = vpack.c.bf16 %v188_v11, %v187_v9  ;;  %v596_v15 = vpack.c.bf16 %v190_v14, %v189_v13  ;;  %v89_v16 = vld [vmem:[#allocation2 + $0x8] sm:$0xff]  ;;  %v191_v17 = vld [vmem:[#allocation7 + $0x30] sm:$0xff]  ;;  %v193_v20 = vld [vmem:[#allocation7 + $0x40] sm:$0xff] }
  0x4e   :  { %585 = vmatprep.subr.bf16.mxu0 %v584_v6  ;;  %589 = vmatprep.subr.bf16.mxu1 %v588_v10  ;;  %v192_v18 = vld [vmem:[#allocation7 + $0x38] sm:$0xff]  ;;  %v194_v21 = vld [vmem:[#allocation7 + $0x48] sm:$0xff]  ;;  %v195_v23 = vld [vmem:[#allocation7 + $0x50] sm:$0xff] }
  0x4f   :  { %591 = vmatpush3.bf16.msra.mxu1 %v588_v10  ;;  %v600_v19 = vpack.c.bf16 %v192_v18, %v191_v17  ;;  %v604_v22 = vpack.c.bf16 %v194_v21, %v193_v20  ;;  %v196_v24 = vld [vmem:[#allocation7 + $0x58] sm:$0xff]  ;;  %v197_v26 = vld [vmem:[#allocation7 + $0x60] sm:$0xff]  ;;  %v198_v27 = vld [vmem:[#allocation7 + $0x68] sm:$0xff] }
  0x50   :  { %593 = vmatprep.subr.bf16.mxu1 %v592_v12  ;;  %v608_v25 = vpack.c.bf16 %v196_v24, %v195_v23  ;;  %v612_v28 = vpack.c.bf16 %v198_v27, %v197_v26  ;;  %v199_v29 = vld [vmem:[#allocation7 + $0x70] sm:$0xff]  ;;  %v200_v30 = vld [vmem:[#allocation7 + $0x78] sm:$0xff]  ;;  %v331_v39 = vld [vmem:[#allocation8] sm:$0xff] }
  0x51   :  { %587 = vmatpush3.bf16.msra.mxu0 %v584_v6  ;;  %v616_v31 = vpack.c.bf16 %v200_v30, %v199_v29  ;;  %v450_v32 = vld [vmem:[%s958_s2] ss:$0 sm:$0xff]  ;;  %v332_v40 = vld [vmem:[#allocation8 + $0x8] sm:$0xff]  ;;  %v334_v52 = vld [vmem:[#allocation8 + $0x18] sm:$0xff] }
  0x52   :  { %v620_v41 = vpack.c.bf16 %v332_v40, %v331_v39  ;;  %v453_v42 = vld [vmem:[%s960_s4] ss:$0 sm:$0xff]  ;;  %v335_v54 = vld [vmem:[#allocation8 + $0x20] sm:$0xff]  ;;  %v336_v55 = vld [vmem:[#allocation8 + $0x28] sm:$0xff] }
  0x53   :  { %595 = vmatpush3.bf16.msra.mxu1 %v592_v12  ;;  %v333_v51 = vld [vmem:[#allocation8 + $0x10] sm:$0xff]  ;;  %v628_v56 = vpack.c.bf16 %v336_v55, %v335_v54  ;;  %v338_v58 = vld [vmem:[#allocation8 + $0x38] sm:$0xff]  ;;  %v339_v60 = vld [vmem:[#allocation8 + $0x40] sm:$0xff] }
  0x54   :  { %508 = vmatmul.mubr.msk.f32.vlgmr.msra.gmra.mrb[0].mxu0 %vm101_vm0, %v89_v16  ;;  %597 = vmatprep.subr.bf16.mxu1 %v596_v15  ;;  %v624_v53 = vpack.c.bf16 %v334_v52, %v333_v51  ;;  %v337_v57 = vld [vmem:[#allocation8 + $0x30] sm:$0xff]  ;;  %v340_v61 = vld [vmem:[#allocation8 + $0x48] sm:$0xff]  ;;  %v342_v0 = vld [vmem:[#allocation8 + $0x58] sm:$0xff] }
  0x55   :  { %621 = vmatprep.subr.bf16.mxu0 %v620_v41  ;;  %v632_v59 = vpack.c.bf16 %v338_v58, %v337_v57  ;;  %v636_v62 = vpack.c.bf16 %v340_v61, %v339_v60  ;;  %v341_v63 = vld [vmem:[#allocation8 + $0x50] sm:$0xff]  ;;  %v343_v1 = vld [vmem:[#allocation8 + $0x60] sm:$0xff]  ;;  %v344_v3 = vld [vmem:[#allocation8 + $0x68] sm:$0xff] }
  0x56   :  { %623 = vmatpush3.bf16.msra.mxu0 %v620_v41  ;;  %v640_v2 = vpack.c.bf16 %v342_v0, %v341_v63  ;;  %v644_v4 = vpack.c.bf16 %v344_v3, %v343_v1  ;;  %v345_v5 = vld [vmem:[#allocation8 + $0x70] sm:$0xff]  ;;  %v346_v6 = vld [vmem:[#allocation8 + $0x78] sm:$0xff] }
  0x57   :  { %599 = vmatpush3.bf16.msra.mxu1 %v596_v15  ;;  %625 = vmatprep.subr.bf16.mxu0 %v624_v53  ;;  %v648_v7 = vpack.c.bf16 %v346_v6, %v345_v5  ;;  %v454_v24 = vld [vmem:[%s961_s5] ss:$0 sm:$0xff] }
  0x58   :  { %601 = vmatprep.subr.bf16.mxu1 %v600_v19 }
  0x5a   :  { %627 = vmatpush3.bf16.msra.mxu0 %v624_v53 }
  0x5b   :  { %603 = vmatpush3.bf16.msra.mxu1 %v600_v19  ;;  %629 = vmatprep.subr.bf16.mxu0 %v628_v56 }
  0x5c   :  { %605 = vmatprep.subr.bf16.mxu1 %v604_v22 }
  0x5e   :  { %631 = vmatpush3.bf16.msra.mxu0 %v628_v56 }
  0x5f   :  { %607 = vmatpush3.bf16.msra.mxu1 %v604_v22  ;;  %633 = vmatprep.subr.bf16.mxu0 %v632_v59 }
  0x60   :  { %609 = vmatprep.subr.bf16.mxu1 %v608_v25 }
  0x62   :  { %635 = vmatpush3.bf16.msra.mxu0 %v632_v59 }
  0x63   :  { %611 = vmatpush3.bf16.msra.mxu1 %v608_v25  ;;  %637 = vmatprep.subr.bf16.mxu0 %v636_v62 }
  0x64   :  { %613 = vmatprep.subr.bf16.mxu1 %v612_v28 }
  0x66   :  { %639 = vmatpush3.bf16.msra.mxu0 %v636_v62 }
  0x67   :  { %615 = vmatpush3.bf16.msra.mxu1 %v612_v28  ;;  %641 = vmatprep.subr.bf16.mxu0 %v640_v2  ;;  %v455_v28 = vld [vmem:[%s962_s6] ss:$0 sm:$0xff]  ;;  %s751_s6 = scalar_lea.vmem %s437_s25, 256 }
  0x68   :  { %617 = vmatprep.subr.bf16.mxu1 %v616_v31  ;;  %p752_p4 = scmp.ne.s32.totalorder %s437_s25, %s751_s6  ;;  %p757_p6 = scmp.lt.s32.totalorder %s751_s6, %s751_s6 }
  0x6a   :  { %643 = vmatpush3.bf16.msra.mxu0 %v640_v2  ;;  %p758_p7 = por %p757_p6, %p756_p5 }
  0x6b   :  { %619 = vmatpush3.bf16.msra.mxu1 %v616_v31  ;;  %645 = vmatprep.subr.bf16.mxu0 %v644_v4 }
  0x6c   :  { %p759_p8 = pnand %p758_p7, %p752_p4 }
  0x6e   :  { %647 = vmatpush3.bf16.msra.mxu0 %v644_v4 }
  0x6f   :  { %649 = vmatprep.subr.bf16.mxu0 %v648_v7 }
  0x72   :  { %651 = vmatpush3.bf16.msra.mxu0 %v648_v7 }
 0x127   :  { %v509_v33 = vpop.f32.mrb[0].mxu0 }
 0x128   :  { %v180_v34 = vadd.f32 %v509_v33, %v450_v32  ;;  %v174_v35 = vpop.f32.mrb[1].mxu0 }
 0x129   :  { %v175_v36 = vadd.f32 %v450_v32, %v174_v35 }
 0x12a   :  { %v184_v38 = vmax.f32 %v180_v34, 0.0 }
 0x12b   :  { %v183_v37 = vmax.f32 %v175_v36, 0.0  ;;  %v456_v36 = vld [vmem:[%s964_s8] ss:$0 sm:$0xff] }
 0x12d   :  { %542 = vmatprep.mubr.f32.mxu1 %v183_v37 }
 0x12e   :  { %543 = vmatmul.mubr.f32.vlgmr.msra.gmra.mrb[0].mxu1 %v184_v38 }
 0x201   :  { %v544_v43 = vpop.f32.mrb[0].mxu1 }
 0x202   :  { %v274_v44 = vpop.f32.mrb[1].mxu1  ;;  %v280_v45 = vadd.f32 %v544_v43, %v453_v42 }
 0x203   :  { %v275_v46 = vadd.f32 %v453_v42, %v274_v44 }
 0x204   :  { %v922_v48 = vmax.f32 %v280_v45, 0.0 }
 0x205   :  { %v920_v47 = vmax.f32 %v275_v46, 0.0 }
 0x206   :  { %v292_v50 = vmul.f32 %v922_v48, %v922_v48 }
 0x207   :  { %287 = vadd.xlane.f32.xlu0 %v920_v47  ;;  %v291_v49 = vmul.f32 %v920_v47, %v920_v47 }
 0x209   :  { %293 = vadd.xlane.f32.xlu1 %v291_v49 }
 0x20b   :  { %289 = vadd.xlane.f32.xlu0 %v922_v48 }
 0x20d   :  { %295 = vadd.xlane.f32.xlu1 %v292_v50 }
 0x294   :  { %v288_v8 = vpop.xlane.xlu0 %287 }
 0x295   :  { %v297_v9 = vmul.f32 0.015625, %v288_v8 }
 0x296   :  { %v294_v10 = vpop.xlane.xlu1 %293 }
 0x297   :  { %v301_v11 = vmul.f32 %v297_v9, %v297_v9  ;;  %v299_v12 = vmul.f32 0.015625, %v294_v10  ;;  %v319_v26 = vsub.f32 %v920_v47, %v297_v9 }
 0x298   :  { %v290_v13 = vpop.xlane.xlu0 %289 }
 0x299   :  { %v303_v14 = vsub.f32 %v299_v12, %v301_v11  ;;  %v298_v15 = vmul.f32 0.015625, %v290_v13 }
 0x29a   :  { %v296_v16 = vpop.xlane.xlu1 %295 }
 0x29b   :  { %v305_v17 = vmax.f32 %v303_v14, 0.0  ;;  %v302_v18 = vmul.f32 %v298_v15, %v298_v15  ;;  %v300_v19 = vmul.f32 0.015625, %v296_v16  ;;  %v320_v31 = vsub.f32 %v922_v48, %v298_v15 }
 0x29d   :  { %v307_v20 = vadd.f32 1e-05, %v305_v17  ;;  %v304_v21 = vsub.f32 %v300_v19, %v302_v18 }
 0x29f   :  { %659 = vrsqrt.f32 %v307_v20  ;;  %v306_v22 = vmax.f32 %v304_v21, 0.0 }
 0x2a1   :  { %v308_v23 = vadd.f32 1e-05, %v306_v22 }
 0x2a3   :  { %661 = vrsqrt.f32 %v308_v23 }
 0x2a9   :  { %v660_v25 = vpop.eup %659 }
 0x2aa   :  { %v317_v27 = vmul.f32 %v660_v25, %v454_v24 }
 0x2ac   :  { %v321_v29 = vmul.f32 %v319_v26, %v317_v27 }
 0x2ad   :  { %v662_v30 = vpop.eup %661 }
 0x2ae   :  { %v318_v32 = vmul.f32 %v662_v30, %v454_v24  ;;  %v329_v33 = vadd.f32 %v455_v28, %v321_v29 }
 0x2b0   :  { %v322_v34 = vmul.f32 %v320_v31, %v318_v32  ;;  %577 = vmatprep.mubr.f32.mxu0 %v329_v33 }
 0x2b2   :  { %v330_v35 = vadd.f32 %v455_v28, %v322_v34 }
 0x2b4   :  { %578 = vmatmul.mubr.f32.vlgmr.msra.gmra.mrb[2].mxu0 %v330_v35 }
 0x387   :  { %v579_v37 = vpop.f32.mrb[2].mxu0 }
 0x388   :  { %v426_v38 = vadd.f32 %v579_v37, %v456_v36  ;;  %v420_v39 = vpop.f32.mrb[3].mxu0 }
 0x389   :  { %v421_v40 = vadd.f32 %v456_v36, %v420_v39 }
 0x38a   :  { %430 = vst [vmem:[#allocation10 + $0x8] sm:$0xff] %v426_v38 }
 0x38b   :  { %429 = vst [vmem:[#allocation10] sm:$0xff] %v421_v40 }
 0x38c   :  { %762 = shalt.err (!%p759_p8)
}
 0x38d   :  { %s763_s8 = scalar_lea.hbm %s965_s9, 256 }
 0x38e   :  { %p764_p9 = scmp.ne.s32.totalorder %s965_s9, %s763_s8  ;;  %p767_p10 = scmp.lt.u32.totalorder %s763_s8, %s965_s9 }
 0x390   :  { %p769_p11 = pnand %p767_p10, %p764_p9 }
 0x392   :  { %772 = shalt.err (!%p769_p11)
}
 0x393   :  { %442 = dma.vmem_to_hbm [thread:$0]  %s437_s25, 256, %s965_s9, [#allocation4], %s783_s21, %s783_s21, %s784_s22  }
 0x394   :  { %779 = dma.done.wait [#allocation4], 256  }
 0x395   :  { %780 = vsyncadd [#allocation4], 4294967040 }
 0x396   :  { %446 = vsyncpa [#allocation3], 1 }
 0x397   :  { %447 = vsyncpa [#allocation6], 1 }
 0x398   :  { %448 = vsyncpa [#allocation9], 1 }
 0x399   :  { %449 = vsyncpa [#allocation4], 1 }

</bundles_post_ra>
